<compile_context>
chip_gen: v7x
topology: tpu7x:2x2x1
jax: 0.10.0
libtpu: 0.0.40
codegen_flags: <defaults>
</compile_context>

<pallas_src>
import functools

import jax
import jax.numpy as jnp
from jax.experimental import pallas as pl
from jax.experimental.pallas import tpu as pltpu


# ---------------------------------------------------------------------------
# Helpers
# ---------------------------------------------------------------------------
def _whole_block(shape):
    """Whole-array BlockSpec for a gridless pallas_call."""
    n = len(shape)
    return pl.BlockSpec(shape, lambda *_, _n=n: (0,) * _n)


# ---------------------------------------------------------------------------
# Fused forward kernel
# ---------------------------------------------------------------------------
def _cnn_fused_kernel(x_ref, w_conv_ref, b_conv_ref, *refs,
                      kernel_sizes, Co, n_mlp):
    # refs = (w_fc1, b_fc1, [w_mlp_i, b_mlp_i]*n_mlp, w_out, b_out, o_ref, win_ref)
    win_ref = refs[-1]            # VMEM scratch for im2col windows
    o_ref = refs[-2]              # (B, num_classes) output
    dense_refs = refs[:-2]        # fc1, mlp layers, output layer (w, b pairs)

    B, S, D = x_ref.shape
    Kmax = max(kernel_sizes)
    nBCo = w_conv_ref.shape[1]    # len(kernel_sizes) * Co

    x = x_ref[...]                                           # (B, S, D) in vregs

    # ---- im2col into VMEM scratch: win[b, t, k*D + d] = x[b, t+k, d] ---------
    # Tail windows (t + k >= S) stay zero; per-branch validity is masked below.
    win_ref[...] = jnp.zeros_like(win_ref)
    for k in range(Kmax):                                    # static unroll, K small
        win_ref[:, 0:S - k, k * D:(k + 1) * D] = x[:, k:S, :]

    # ---- ONE MXU contraction over K_max*D for all conv branches at once ------
    conv = jnp.einsum("btf,fc->btc", win_ref[...], w_conv_ref[...],
                      preferred_element_type=jnp.float32)    # (B, S, nB*Co)

    # ---- mask time steps that are invalid for each branch, max-over-time -----
    t_idx = jax.lax.broadcasted_iota(jnp.int32, (B, S, nBCo), 1)
    c_idx = jax.lax.broadcasted_iota(jnp.int32, (B, S, nBCo), 2)
    valid = None
    for j, K in enumerate(kernel_sizes):                     # static unroll
        in_branch = jnp.logical_and(c_idx >= j * Co, c_idx < (j + 1) * Co)
        ok = jnp.logical_and(in_branch, t_idx < (S - K + 1))
        valid = ok if valid is None else jnp.logical_or(valid, ok)
    masked = jnp.where(valid, conv, -jnp.inf)
    pooled = jnp.max(masked, axis=1)                         # (B, nB*Co)

    # bias + ReLU hoisted after the max (both monotone -> identical result)
    feat = jnp.maximum(pooled + b_conv_ref[...], 0.0)        # (B, nB*Co)

    # ---- fc1 + MLP(sigmoid) + final Linear + softmax (all VMEM-resident) -----
    def dense(h, w_ref, b_ref):
        return jnp.dot(h, w_ref[...], preferred_element_type=jnp.float32) + b_ref[...]

    h = dense(feat, dense_refs[0], dense_refs[1])            # fc1 (no activation)
    for i in range(n_mlp):                                   # Linear + Sigmoid (+ dropout = id)
        y = dense(h, dense_refs[2 + 2 * i], dense_refs[3 + 2 * i])
        # sigmoid: 1 / (1 + exp(-y)); divide moved to the EUP via approx reciprocal
        h = pl.reciprocal(1.0 + jnp.exp(-y), approx=True)

    logits = dense(h, dense_refs[-2], dense_refs[-1])        # final Linear
    logits = logits - jnp.max(logits, axis=-1, keepdims=True)
    e = jnp.exp(logits)
    # exact reciprocal for the softmax normalization (rows sum to 1 in f32)
    o_ref[...] = e * pl.reciprocal(jnp.sum(e, axis=-1, keepdims=True))


def cnn_forward(params, x, kernel_sizes, embed=0):
    if embed:
        # nn.Embedding lookup (gather) stays in plain JAX; feeds the fused kernel.
        x = jnp.take(params["embed"], x, axis=0)
    x = x.astype(jnp.float32)
    B, S, D = x.shape
    Kmax = max(kernel_sizes)
    assert S >= Kmax, "seq_len must be >= the largest conv kernel size"

    w_conv, b_conv = params["conv_w"], params["conv_b"]      # (Kmax*D, nB*Co), (1, nB*Co)
    Co = b_conv.shape[1] // len(kernel_sizes)

    dense = list(params["fc1"])
    for wb in params["mlp"]:
        dense += list(wb)
    dense += list(params["mlp_out"])
    n_mlp = len(params["mlp"])
    num_classes = params["mlp_out"][0].shape[1]

    inputs = [x, w_conv, b_conv] + dense
    kernel = functools.partial(_cnn_fused_kernel,
                               kernel_sizes=tuple(kernel_sizes),
                               Co=Co, n_mlp=n_mlp)

    # TODO(synk): at realistic sizes (large B/S/D), add a batch grid with
    # dimension_semantics=("parallel",) and per-tile BlockSpecs so v7x's second
    # TensorCore is used and the x tile + double buffering stays under 64 MiB VMEM.
    return pl.pallas_call(
        kernel,
        out_shape=jax.ShapeDtypeStruct((B, num_classes), jnp.float32),
        in_specs=[_whole_block(a.shape) for a in inputs],
        out_specs=_whole_block((B, num_classes)),
        scratch_shapes=[pltpu.VMEM((B, S, Kmax * D), jnp.float32)],
    )(*inputs)


# ---------------------------------------------------------------------------
# Parameter init (deterministic, PyTorch-like), with conv branches pre-merged
# ---------------------------------------------------------------------------
def init_params(key, *, vocab_size, feature_dim, kernel_num, kernel_sizes,
                cnn_out, mlp_hidden, num_classes):
    n_keys = 4 + 2 * len(kernel_sizes) + 2 * (len(mlp_hidden) + 2)
    keys = iter(jax.random.split(key, n_keys))

    def uinit(k, shape, fan_in):
        bound = 1.0 / jnp.sqrt(jnp.float32(fan_in))
        return jax.random.uniform(k, shape, jnp.float32, -bound, bound)

    params = {}
    # Embedding (padding_idx=0 row zeroed) -- used only for the embed=1 path.
    emb = jax.random.normal(next(keys), (vocab_size, feature_dim), jnp.float32) * 0.1
    params["embed"] = emb.at[0].set(0.0)

    # Conv branches: PyTorch (Co, 1, K, D) ≡ (K, D, Co) here.  Zero-pad each to
    # K_max along the kernel-height axis and concatenate along Co so all branches
    # become ONE (K_max*D, nB*Co) matmul against the im2col windows.
    Kmax = max(kernel_sizes)
    w_blocks, b_blocks = [], []
    for K in kernel_sizes:
        fan_in = K * feature_dim
        w = uinit(next(keys), (K, feature_dim, kernel_num), fan_in)
        b = uinit(next(keys), (1, kernel_num), fan_in)
        w_blocks.append(jnp.pad(w, ((0, Kmax - K), (0, 0), (0, 0))))
        b_blocks.append(b)
    w_all = jnp.concatenate(w_blocks, axis=2)                # (Kmax, D, nB*Co)
    params["conv_w"] = w_all.reshape(Kmax * feature_dim,
                                     len(kernel_sizes) * kernel_num)
    params["conv_b"] = jnp.concatenate(b_blocks, axis=1)     # (1, nB*Co)

    # fc1: (len(Ks)*Co) -> cnn_out
    fin = len(kernel_sizes) * kernel_num
    params["fc1"] = (uinit(next(keys), (fin, cnn_out), fin),
                     uinit(next(keys), (1, cnn_out), fin))

    # MLP: dims [cnn_out] + mlp_hidden, sigmoid-activated, then -> num_classes
    dims = [cnn_out] + list(mlp_hidden)
    params["mlp"] = []
    for i in range(len(dims) - 1):
        params["mlp"].append((uinit(next(keys), (dims[i], dims[i + 1]), dims[i]),
                              uinit(next(keys), (1, dims[i + 1]), dims[i])))
    params["mlp_out"] = (uinit(next(keys), (dims[-1], num_classes), dims[-1]),
                         uinit(next(keys), (1, num_classes), dims[-1]))
    return params


# ---------------------------------------------------------------------------
if __name__ == "__main__":
    # args
    vocab_size = 50
    feature_dim = 32
    kernel_num = 8
    kernel_sizes = [3, 4, 5]
    cnn_out = 16
    mlp_hidden = [16]          # forward sees [cnn_out] + mlp_hidden
    num_classes = 4

    B, S = 2, 8

    key = jax.random.PRNGKey(0)
    k_param, k_x = jax.random.split(key)
    params = init_params(
        k_param,
        vocab_size=vocab_size,
        feature_dim=feature_dim,
        kernel_num=kernel_num,
        kernel_sizes=kernel_sizes,
        cnn_out=cnn_out,
        mlp_hidden=mlp_hidden,
        num_classes=num_classes,
    )

    # embed=0 path: x already has shape (batch, seq_len, feature_dim)
    x = jax.random.normal(k_x, (B, S, feature_dim), jnp.float32)

    fwd = jax.jit(functools.partial(cnn_forward,
                                    kernel_sizes=tuple(kernel_sizes), embed=0))
    out = fwd(params, x)
    out = jax.block_until_ready(out)

    assert out.shape == (B, num_classes)
    assert bool(jnp.all(jnp.isfinite(out)))
    # softmax rows sum to 1 (exact reciprocal used for the normalization)
    assert bool(jnp.allclose(jnp.sum(out, axis=-1), 1.0, atol=1e-5))
    print("KERNEL_OK")
</pallas_src>

<mosaic_0001>
module attributes {stable_mosaic.version = 11 : i64} {
  func.func @_cnn_fused_kernel(%arg0: memref<2x8x32xf32, #tpu.memory_space<vmem>>, %arg1: memref<160x24xf32, #tpu.memory_space<vmem>>, %arg2: memref<1x24xf32, #tpu.memory_space<vmem>>, %arg3: memref<24x16xf32, #tpu.memory_space<vmem>>, %arg4: memref<1x16xf32, #tpu.memory_space<vmem>>, %arg5: memref<16x16xf32, #tpu.memory_space<vmem>>, %arg6: memref<1x16xf32, #tpu.memory_space<vmem>>, %arg7: memref<16x4xf32, #tpu.memory_space<vmem>>, %arg8: memref<1x4xf32, #tpu.memory_space<vmem>>, %arg9: memref<2x4xf32, #tpu.memory_space<vmem>>, %arg10: memref<2x8x160xf32, #tpu.memory_space<vmem>>) attributes {dimension_semantics = [], scalar_prefetch = 0 : i64, scratch_operands = 1 : i64, tpu.core_type = #tpu.core_type<tc>} {
    %c0 = arith.constant 0 : index
    %c0_0 = arith.constant 0 : index
    %c0_1 = arith.constant 0 : index
    %0 = vector.load %arg0[%c0, %c0_0, %c0_1] : memref<2x8x32xf32, #tpu.memory_space<vmem>>, vector<2x8x32xf32>
    %cst = arith.constant 0.000000e+00 : f32
    %1 = vector.broadcast %cst : f32 to vector<2x8x160xf32>
    %c0_2 = arith.constant 0 : index
    %c0_3 = arith.constant 0 : index
    %c0_4 = arith.constant 0 : index
    %2 = vector.load %arg10[%c0_2, %c0_3, %c0_4] : memref<2x8x160xf32, #tpu.memory_space<vmem>>, vector<2x8x160xf32>
    tpu.vector_store %arg10[%c0_2, %c0_3, %c0_4], %1 {strides = array<i32>} : memref<2x8x160xf32, #tpu.memory_space<vmem>>, vector<2x8x160xf32>,
    %c0_5 = arith.constant 0 : index
    %c0_6 = arith.constant 0 : index
    %c0_7 = arith.constant 0 : index
    %3 = vector.load %arg10[%c0_5, %c0_6, %c0_7] : memref<2x8x160xf32, #tpu.memory_space<vmem>>, vector<2x8x32xf32>
    tpu.vector_store %arg10[%c0_5, %c0_6, %c0_7], %0 {strides = array<i32>} : memref<2x8x160xf32, #tpu.memory_space<vmem>>, vector<2x8x32xf32>,
    %4 = vector.extract_strided_slice %0 {offsets = [0, 1, 0], sizes = [2, 7, 32], strides = [1, 1, 1]} : vector<2x8x32xf32> to vector<2x7x32xf32>
    %c0_8 = arith.constant 0 : index
    %c0_9 = arith.constant 0 : index
    %c32 = arith.constant 32 : index
    %5 = vector.load %arg10[%c0_8, %c0_9, %c32] : memref<2x8x160xf32, #tpu.memory_space<vmem>>, vector<2x7x32xf32>
    tpu.vector_store %arg10[%c0_8, %c0_9, %c32], %4 {strides = array<i32>} : memref<2x8x160xf32, #tpu.memory_space<vmem>>, vector<2x7x32xf32>,
    %6 = vector.extract_strided_slice %0 {offsets = [0, 2, 0], sizes = [2, 6, 32], strides = [1, 1, 1]} : vector<2x8x32xf32> to vector<2x6x32xf32>
    %c0_10 = arith.constant 0 : index
    %c0_11 = arith.constant 0 : index
    %c64 = arith.constant 64 : index
    %7 = vector.load %arg10[%c0_10, %c0_11, %c64] : memref<2x8x160xf32, #tpu.memory_space<vmem>>, vector<2x6x32xf32>
    tpu.vector_store %arg10[%c0_10, %c0_11, %c64], %6 {strides = array<i32>} : memref<2x8x160xf32, #tpu.memory_space<vmem>>, vector<2x6x32xf32>,
    %8 = vector.extract_strided_slice %0 {offsets = [0, 3, 0], sizes = [2, 5, 32], strides = [1, 1, 1]} : vector<2x8x32xf32> to vector<2x5x32xf32>
    %c0_12 = arith.constant 0 : index
    %c0_13 = arith.constant 0 : index
    %c96 = arith.constant 96 : index
    %9 = vector.load %arg10[%c0_12, %c0_13, %c96] : memref<2x8x160xf32, #tpu.memory_space<vmem>>, vector<2x5x32xf32>
    tpu.vector_store %arg10[%c0_12, %c0_13, %c96], %8 {strides = array<i32>} : memref<2x8x160xf32, #tpu.memory_space<vmem>>, vector<2x5x32xf32>,
    %10 = vector.extract_strided_slice %0 {offsets = [0, 4, 0], sizes = [2, 4, 32], strides = [1, 1, 1]} : vector<2x8x32xf32> to vector<2x4x32xf32>
    %c0_14 = arith.constant 0 : index
    %c0_15 = arith.constant 0 : index
    %c128 = arith.constant 128 : index
    %11 = vector.load %arg10[%c0_14, %c0_15, %c128] : memref<2x8x160xf32, #tpu.memory_space<vmem>>, vector<2x4x32xf32>
    tpu.vector_store %arg10[%c0_14, %c0_15, %c128], %10 {strides = array<i32>} : memref<2x8x160xf32, #tpu.memory_space<vmem>>, vector<2x4x32xf32>,
    %c0_16 = arith.constant 0 : index
    %c0_17 = arith.constant 0 : index
    %c0_18 = arith.constant 0 : index
    %12 = vector.load %arg10[%c0_16, %c0_17, %c0_18] : memref<2x8x160xf32, #tpu.memory_space<vmem>>, vector<2x8x160xf32>
    %c0_19 = arith.constant 0 : index
    %c0_20 = arith.constant 0 : index
    %13 = vector.load %arg1[%c0_19, %c0_20] : memref<160x24xf32, #tpu.memory_space<vmem>>, vector<160x24xf32>
    "tpu.trace_start"() <{level = 10 : i32, message = "btf,fc->btc"}> : () -> ()
    %cst_21 = arith.constant dense<0.000000e+00> : vector<2x8x24xf32>
    %14 = tpu.matmul %12, %13, %cst_21 {dimension_numbers = #tpu.dot_dimension_numbers<[2], [0], [0, 1], [1], [0, 0, 0, 1, 1, 1], [], []>} : vector<2x8x160xf32>, vector<160x24xf32>, vector<2x8x24xf32> -> vector<2x8x24xf32>
    "tpu.trace_stop"() : () -> ()
    %15 = tpu.iota {dimensions = array<i32: 1>} : vector<2x8x24xi32>
    %16 = tpu.iota {dimensions = array<i32: 2>} : vector<2x8x24xi32>
    %c0_i32 = arith.constant 0 : i32
    %17 = vector.broadcast %c0_i32 : i32 to vector<2x8x24xi32>
    %18 = arith.cmpi sge, %16, %17 : vector<2x8x24xi32>
    %c8_i32 = arith.constant 8 : i32
    %19 = vector.broadcast %c8_i32 : i32 to vector<2x8x24xi32>
    %20 = arith.cmpi slt, %16, %19 : vector<2x8x24xi32>
    %21 = arith.andi %18, %20 : vector<2x8x24xi1>
    %c6_i32 = arith.constant 6 : i32
    %22 = vector.broadcast %c6_i32 : i32 to vector<2x8x24xi32>
    %23 = arith.cmpi slt, %15, %22 : vector<2x8x24xi32>
    %24 = arith.andi %21, %23 : vector<2x8x24xi1>
    %c8_i32_22 = arith.constant 8 : i32
    %25 = vector.broadcast %c8_i32_22 : i32 to vector<2x8x24xi32>
    %26 = arith.cmpi sge, %16, %25 : vector<2x8x24xi32>
    %c16_i32 = arith.constant 16 : i32
    %27 = vector.broadcast %c16_i32 : i32 to vector<2x8x24xi32>
    %28 = arith.cmpi slt, %16, %27 : vector<2x8x24xi32>
    %29 = arith.andi %26, %28 : vector<2x8x24xi1>
    %c5_i32 = arith.constant 5 : i32
    %30 = vector.broadcast %c5_i32 : i32 to vector<2x8x24xi32>
    %31 = arith.cmpi slt, %15, %30 : vector<2x8x24xi32>
    %32 = arith.andi %29, %31 : vector<2x8x24xi1>
    %33 = arith.ori %24, %32 : vector<2x8x24xi1>
    %c16_i32_23 = arith.constant 16 : i32
    %34 = vector.broadcast %c16_i32_23 : i32 to vector<2x8x24xi32>
    %35 = arith.cmpi sge, %16, %34 : vector<2x8x24xi32>
    %c24_i32 = arith.constant 24 : i32
    %36 = vector.broadcast %c24_i32 : i32 to vector<2x8x24xi32>
    %37 = arith.cmpi slt, %16, %36 : vector<2x8x24xi32>
    %38 = arith.andi %35, %37 : vector<2x8x24xi1>
    %c4_i32 = arith.constant 4 : i32
    %39 = vector.broadcast %c4_i32 : i32 to vector<2x8x24xi32>
    %40 = arith.cmpi slt, %15, %39 : vector<2x8x24xi32>
    %41 = arith.andi %38, %40 : vector<2x8x24xi1>
    %42 = arith.ori %33, %41 : vector<2x8x24xi1>
    %cst_24 = arith.constant 0xFF800000 : f32
    %43 = vector.broadcast %cst_24 : f32 to vector<2x8x24xf32>
    %44 = arith.select %42, %14, %43 : vector<2x8x24xi1>, vector<2x8x24xf32>
    %cst_25 = arith.constant dense<0xFF800000> : vector<2x24xf32>
    %45 = vector.multi_reduction <maximumf>, %44, %cst_25 [1] : vector<2x8x24xf32> to vector<2x24xf32>
    %c0_26 = arith.constant 0 : index
    %c0_27 = arith.constant 0 : index
    %46 = vector.load %arg2[%c0_26, %c0_27] : memref<1x24xf32, #tpu.memory_space<vmem>>, vector<1x24xf32>
    %47 = vector.broadcast %46 : vector<1x24xf32> to vector<2x24xf32>
    %48 = arith.addf %45, %47 : vector<2x24xf32>
    %cst_28 = arith.constant 0.000000e+00 : f32
    %49 = vector.broadcast %cst_28 : f32 to vector<2x24xf32>
    %50 = arith.maximumf %48, %49 : vector<2x24xf32>
    %c0_29 = arith.constant 0 : index
    %c0_30 = arith.constant 0 : index
    %51 = vector.load %arg3[%c0_29, %c0_30] : memref<24x16xf32, #tpu.memory_space<vmem>>, vector<24x16xf32>
    %cst_31 = arith.constant dense<0.000000e+00> : vector<2x16xf32>
    %52 = tpu.matmul %50, %51, %cst_31 {dimension_numbers = #tpu.dot_dimension_numbers<[1], [0], [0], [1], [0, 0, 1, 1], [], []>} : vector<2x24xf32>, vector<24x16xf32>, vector<2x16xf32> -> vector<2x16xf32>
    %c0_32 = arith.constant 0 : index
    %c0_33 = arith.constant 0 : index
    %53 = vector.load %arg4[%c0_32, %c0_33] : memref<1x16xf32, #tpu.memory_space<vmem>>, vector<1x16xf32>
    %54 = vector.broadcast %53 : vector<1x16xf32> to vector<2x16xf32>
    %55 = arith.addf %52, %54 : vector<2x16xf32>
    %c0_34 = arith.constant 0 : index
    %c0_35 = arith.constant 0 : index
    %56 = vector.load %arg5[%c0_34, %c0_35] : memref<16x16xf32, #tpu.memory_space<vmem>>, vector<16x16xf32>
    %cst_36 = arith.constant dense<0.000000e+00> : vector<2x16xf32>
    %57 = tpu.matmul %55, %56, %cst_36 {dimension_numbers = #tpu.dot_dimension_numbers<[1], [0], [0], [1], [0, 0, 1, 1], [], []>} : vector<2x16xf32>, vector<16x16xf32>, vector<2x16xf32> -> vector<2x16xf32>
    %c0_37 = arith.constant 0 : index
    %c0_38 = arith.constant 0 : index
    %58 = vector.load %arg6[%c0_37, %c0_38] : memref<1x16xf32, #tpu.memory_space<vmem>>, vector<1x16xf32>
    %59 = vector.broadcast %58 : vector<1x16xf32> to vector<2x16xf32>
    %60 = arith.addf %57, %59 : vector<2x16xf32>
    %cst_39 = arith.constant 0.000000e+00 : f32
    %61 = vector.broadcast %cst_39 : f32 to vector<2x16xf32>
    %62 = arith.subf %61, %60 : vector<2x16xf32>
    %63 = math.exp %62 : vector<2x16xf32>
    %cst_40 = arith.constant 1.000000e+00 : f32
    %64 = vector.broadcast %cst_40 : f32 to vector<2x16xf32>
    %65 = arith.addf %64, %63 : vector<2x16xf32>
    %66 = tpu.reciprocal %65 {approx = true} : vector<2x16xf32> -> vector<2x16xf32>
    %c0_41 = arith.constant 0 : index
    %c0_42 = arith.constant 0 : index
    %67 = vector.load %arg7[%c0_41, %c0_42] : memref<16x4xf32, #tpu.memory_space<vmem>>, vector<16x4xf32>
    %cst_43 = arith.constant dense<0.000000e+00> : vector<2x4xf32>
    %68 = tpu.matmul %66, %67, %cst_43 {dimension_numbers = #tpu.dot_dimension_numbers<[1], [0], [0], [1], [0, 0, 1, 1], [], []>} : vector<2x16xf32>, vector<16x4xf32>, vector<2x4xf32> -> vector<2x4xf32>
    %c0_44 = arith.constant 0 : index
    %c0_45 = arith.constant 0 : index
    %69 = vector.load %arg8[%c0_44, %c0_45] : memref<1x4xf32, #tpu.memory_space<vmem>>, vector<1x4xf32>
    %70 = vector.broadcast %69 : vector<1x4xf32> to vector<2x4xf32>
    %71 = arith.addf %68, %70 : vector<2x4xf32>
    %cst_46 = arith.constant dense<0xFF800000> : vector<2xf32>
    %72 = vector.multi_reduction <maximumf>, %71, %cst_46 [1] : vector<2x4xf32> to vector<2xf32>
    %73 = vector.shape_cast %72 : vector<2xf32> to vector<2x1xf32>
    %74 = vector.broadcast %73 : vector<2x1xf32> to vector<2x4xf32>
    %75 = arith.subf %71, %74 : vector<2x4xf32>
    %76 = math.exp %75 : vector<2x4xf32>
    %cst_47 = arith.constant dense<0.000000e+00> : vector<2xf32>
    %77 = vector.multi_reduction <add>, %76, %cst_47 [1] : vector<2x4xf32> to vector<2xf32>
    %78 = vector.shape_cast %77 : vector<2xf32> to vector<2x1xf32>
    %79 = tpu.reciprocal %78 : vector<2x1xf32> -> vector<2x1xf32>
    %80 = vector.broadcast %79 : vector<2x1xf32> to vector<2x4xf32>
    %81 = arith.mulf %76, %80 : vector<2x4xf32>
    %c0_48 = arith.constant 0 : index
    %c0_49 = arith.constant 0 : index
    %82 = vector.load %arg9[%c0_48, %c0_49] : memref<2x4xf32, #tpu.memory_space<vmem>>, vector<2x4xf32>
    tpu.vector_store %arg9[%c0_48, %c0_49], %81 {strides = array<i32>} : memref<2x4xf32, #tpu.memory_space<vmem>>, vector<2x4xf32>,
    return
  }
}

</mosaic_0001>

<bundles_post_ra>
// kernel: cnn_forward.1
= control target key start
LH: loop header
LB: loop body
LE: loop exit
PB: predicated region body
PF: predicated region fallthrough
CT: control target
= control target key end

     0   :  { %v642_v6 = vmov 0.0|0.0   ;;  %s643_s20 = smov 32   ;;  %s644_s21 = smov 96   ;;  %vm36_vm0 = vcmask 261120   ;;  %v645_v14 = vmov 0.0   ;;  %vm81_vm1 = vcmask 257024   ;;  %s850_s0 = inlined_call_operand.vmem [shape: f32[2,8,32], index: 0, kind: input, shape index: {}]   ;;  %s851_s1 = inlined_call_operand.vmem [shape: f32[160,24], index: 1, kind: input, shape index: {}]   ;;  %s852_s2 = inlined_call_operand.vmem [shape: f32[1,24], index: 2, kind: input, shape index: {}]   ;;  %s853_s3 = inlined_call_operand.vmem [shape: f32[24,16], index: 3, kind: input, shape index: {}]   ;;  %s854_s4 = inlined_call_operand.vmem [shape: f32[1,16], index: 4, kind: input, shape index: {}]   ;;  %s855_s5 = inlined_call_operand.vmem [shape: f32[16,16], index: 5, kind: input, shape index: {}]   ;;  %s856_s6 = inlined_call_operand.vmem [shape: f32[1,16], index: 6, kind: input, shape index: {}]   ;;  %s857_s7 = inlined_call_operand.vmem [shape: f32[16,4], index: 7, kind: input, shape index: {}]   ;;  %s858_s8 = inlined_call_operand.vmem [shape: f32[1,4], index: 8, kind: input, shape index: {}]   ;;  %s859_s9 = inlined_call_operand.hbm [shape: f32[2,4], index: 9, kind: output, shape index: {}]  }
   0x1   :  { %v33_v0 = vld [vmem:[%s850_s0] sm:$0xff]  ;;  %v34_v1 = vld [vmem:[%s850_s0 + $0x8] sm:$0xff]  ;;  %564 = vmatprep.subr.bf16.mxu0 %v642_v6  ;;  %594 = vmatprep.subr.bf16.mxu1 %v642_v6  ;;  %v90_v10 = vld [vmem:[%s851_s1 + $0x10] sm:$0xff]  ;;  %35 = vst [vmem:[#allocation2] sm:$0xff] %v645_v14  ;;  %s646_s26 = smov 64  }
   0x2   :  { %v88_v2 = vld [vmem:[%s851_s1] sm:$0xff]  ;;  %v44_v3 = vrot.slane %v33_v0, 1  ;;  %v77_v4 = vrot.slane %v33_v0, 4  ;;  %v66_v5 = vrot.slane %v33_v0, 3  ;;  %v89_v7 = vld [vmem:[%s851_s1 + $0x8] sm:$0xff]  ;;  %v55_v8 = vrot.slane %v33_v0, 2 }
   0x3   :  { %v78_v9 = vrot.slane %v34_v1, 4  ;;  %v91_v11 = vld [vmem:[%s851_s1 + $0x18] sm:$0xff]  ;;  %v45_v12 = vrot.slane %v34_v1, 1  ;;  %v565_v13 = vpack.c.bf16 %v89_v7, %v88_v2  ;;  %37 = vst.msk [vmem:[#allocation2 + $0x8] sm:$0xff] %vm36_vm0, %v645_v14  ;;  %39 = vst.msk [vmem:[#allocation2 + $0x18] sm:$0xff] %vm36_vm0, %v645_v14  ;;  %v92_v16 = vld [vmem:[%s851_s1 + $0x20] sm:$0xff] }
   0x4   :  { %46 = vrot.lane.b32.xlu0 %v44_v3, %s643_s20  ;;  %68 = vrot.lane.b32.xlu1 %v66_v5, %s644_s21  ;;  %38 = vst [vmem:[#allocation2 + $0x10] sm:$0xff] %v645_v14  ;;  %v568_v15 = vpack.c.bf16 %v91_v11, %v90_v10  ;;  %82 = vst.msk [vmem:[#allocation2 + $0x8] sm:$0xf] %vm81_vm1, %v77_v4  ;;  %v93_v17 = vld [vmem:[%s851_s1 + $0x28] sm:$0xff]  ;;  %v56_v18 = vrot.slane %v34_v1, 2  ;;  %v67_v19 = vrot.slane %v34_v1, 3 }
   0x5   :  { %566 = vmatpush1.bf16.msra.mxu0 %v565_v13  ;;  %83 = vst.msk [vmem:[#allocation2 + $0x18] sm:$0xf] %vm81_vm1, %v78_v9  ;;  %v571_v20 = vpack.c.bf16 %v93_v17, %v92_v16 }
   0x6   :  { %40 = vst.msk [vmem:[#allocation2] sm:$0xff] %vm36_vm0, %v33_v0  ;;  %41 = vst.msk [vmem:[#allocation2 + $0x10] sm:$0xff] %vm36_vm0, %v34_v1  ;;  %567 = vmatprep.subr.bf16.mxu0 %v642_v6 }
   0x8   :  { %57 = vrot.lane.b32.xlu0 %v55_v8, %s646_s26  ;;  %48 = vrot.lane.b32.xlu1 %v45_v12, %s643_s20 }
   0x9   :  { %569 = vmatpush1.bf16.msra.mxu0 %v568_v15 }
   0xa   :  { %14 = vsyncpa [#allocation4], 0  ;;  %570 = vmatprep.subr.bf16.mxu0 %v642_v6  ;;  %v94_v21 = vld [vmem:[%s851_s1 + $0x30] sm:$0xff]  ;;  %v95_v22 = vld [vmem:[%s851_s1 + $0x38] sm:$0xff]  ;;  %vm52_vm2 = vcmask 522496   ;;  %vm63_vm3 = vcmask 783872   ;;  %v189_v56 = vlaneseq }
   0xb   :  { %v85_v23 = vld [vmem:[#allocation2 + $0x8] sm:$0xff]  ;;  %v574_v24 = vpack.c.bf16 %v95_v22, %v94_v21  ;;  %v96_v25 = vld [vmem:[%s851_s1 + $0x40] sm:$0xff]  ;;  %v98_v28 = vld [vmem:[%s851_s1 + $0x50] sm:$0xff]  ;;  %vm74_vm4 = vcmask 1045248   ;;  %vm860_vm5 = vmmov 0  }
   0xc   :  { %59 = vrot.lane.b32.xlu0 %v56_v18, %s646_s26  ;;  %70 = vrot.lane.b32.xlu1 %v67_v19, %s644_s21  ;;  %v97_v26 = vld [vmem:[%s851_s1 + $0x48] sm:$0xff]  ;;  %v99_v29 = vld [vmem:[%s851_s1 + $0x58] sm:$0xff]  ;;  %v192_v57 = vand.u32 127, %v189_v56  ;;  %v190_v58 = vshrl.u32 %v189_v56, 7 }
   0xd   :  { %572 = vmatpush1.bf16.msra.mxu0 %v571_v20  ;;  %522 = vmatprep.mubr.msk.f32.mxu0 %vm36_vm0, %v85_v23  ;;  %v577_v27 = vpack.c.bf16 %v97_v26, %v96_v25  ;;  %v580_v30 = vpack.c.bf16 %v99_v29, %v98_v28  ;;  %v100_v31 = vld [vmem:[%s851_s1 + $0x60] sm:$0xff]  ;;  %v101_v32 = vld [vmem:[%s851_s1 + $0x68] sm:$0xff]  ;;  %v102_v34 = vld [vmem:[%s851_s1 + $0x70] sm:$0xff] }
   0xe   :  { %573 = vmatprep.subr.bf16.mxu0 %v642_v6  ;;  %v583_v33 = vpack.c.bf16 %v101_v32, %v100_v31  ;;  %v103_v35 = vld [vmem:[%s851_s1 + $0x78] sm:$0xff]  ;;  %v104_v37 = vld [vmem:[%s851_s1 + $0x80] sm:$0xff]  ;;  %v105_v38 = vld [vmem:[%s851_s1 + $0x88] sm:$0xff]  ;;  %547 = vmatprep.mubr.msk.f32.mxu1 %vm860_vm5, %v645_v14  ;;  %vm198_vm6 = vcmp.ge.s32.totalorder %v192_v57, 8  ;;  %vm199_vm7 = vcmp.lt.s32.totalorder %v192_v57, 16  ;;  %vm194_vm8 = vcmp.lt.s32.totalorder %v192_v57, 8 }
   0xf   :  { %v586_v36 = vpack.c.bf16 %v103_v35, %v102_v34  ;;  %v589_v39 = vpack.c.bf16 %v105_v38, %v104_v37  ;;  %v106_v40 = vld [vmem:[%s851_s1 + $0x90] sm:$0xff]  ;;  %v107_v41 = vld [vmem:[%s851_s1 + $0x98] sm:$0xff]  ;;  %v238_v52 = vld [vmem:[%s853_s3] sm:$0xff]  ;;  %vm196_vm9 = vcmp.lt.s32.totalorder %v190_v58, 6  ;;  %vm201_vm11 = vcmp.lt.s32.totalorder %v190_v58, 5 }
  0x10   :  { %v592_v42 = vpack.c.bf16 %v107_v41, %v106_v40  ;;  %v87_v49 = vld [vmem:[#allocation2 + $0x18] sm:$0xff]  ;;  %v239_v53 = vld [vmem:[%s853_s3 + $0x8] sm:$0xff]  ;;  %v240_v55 = vld [vmem:[%s853_s3 + $0x10] sm:$0xff]  ;;  %vm204_vm12 = vcmp.ge.s32.totalorder %v192_v57, 16  ;;  %vm205_vm13 = vcmp.lt.s32.totalorder %v192_v57, 24  ;;  %vm207_vm1 = vcmp.lt.s32.totalorder %v190_v58, 4 }
  0x11   :  { %575 = vmatpush1.bf16.msra.mxu0 %v574_v24  ;;  %v595_v54 = vpack.c.bf16 %v239_v53, %v238_v52  ;;  %vm200_vm10 = vmand %vm198_vm6, %vm199_vm7  ;;  %vm212_vm5 = vcmask 195584   ;;  %v524_v16 = vld [vmem:[%s852_s2] ss:$0 sm:$0xff]  ;;  %v326_v21 = vld [vmem:[%s855_s5 + $0x8] sm:$0xff]  ;;  %vm251_vm6 = vcmask 1041409   ;;  %vm862_vm7 = vmmov 0  }
  0x12   :  { %576 = vmatprep.subr.bf16.mxu0 %v642_v6  ;;  %vm197_vm14 = vmand %vm194_vm8, %vm196_vm9  ;;  %v325_v20 = vld [vmem:[%s855_s5] sm:$0xff]  ;;  %vm334_vm8 = vcmask 130048  }
  0x13   :  { %596 = vmatpush3.bf16.msra.mxu1 %v595_v54  ;;  %vm202_vm15 = vmand %vm200_vm10, %vm201_vm11  ;;  %v598_v25 = vpack.c.bf16 %v326_v21, %v325_v20  ;;  %v413_v31 = vld [vmem:[%s857_s7] sm:$0xff] }
  0x14   :  { %545 = vmatprep.subr.mxu1 %v645_v14  ;;  %v529_v41 = vld [vmem:[%s858_s8] ss:$0 sm:$0xff] }
  0x15   :  { %578 = vmatpush1.bf16.msra.mxu0 %v577_v27  ;;  %v525_v27 = vld [vmem:[%s854_s4] ss:$0 sm:$0xff] }
  0x16   :  { %579 = vmatprep.subr.bf16.mxu0 %v642_v6 }
  0x17   :  { %546 = vmatpush3.msra.mxu1 %v240_v55 }
  0x18   :  { %597 = vmatprep.subr.bf16.mxu1 %v642_v6 }
  0x19   :  { %581 = vmatpush1.bf16.msra.mxu0 %v580_v30 }
  0x1a   :  { %582 = vmatprep.subr.bf16.mxu0 %v642_v6 }
  0x1d   :  { %584 = vmatpush1.bf16.msra.mxu0 %v583_v33  ;;  %v527_v33 = vld [vmem:[%s856_s6] ss:$0 sm:$0xff]  ;;  %s648_s6 = smov [#allocation3]  }
  0x1e   :  { %585 = vmatprep.subr.bf16.mxu0 %v642_v6  ;;  %s514_s27 = sshll.u32 %s648_s6, 4  ;;  %s515_s27 = int_to_ptr.vmem [resolvable:$true] %s514_s27 }
  0x1f   :  { %s618_s8 = scalar_lea.vmem %s515_s27, 32  ;;  %p623_p1 = scmp.lt.s32.totalorder %s515_s27, %s515_s27 }
  0x20   :  { %p619_p0 = scmp.ne.s32.totalorder %s515_s27, %s618_s8  ;;  %p624_p2 = scmp.lt.s32.totalorder %s618_s8, %s618_s8 }
  0x21   :  { %587 = vmatpush1.bf16.msra.mxu0 %v586_v36 }
  0x22   :  { %588 = vmatprep.subr.bf16.mxu0 %v642_v6  ;;  %p625_p3 = por %p624_p2, %p623_p1 }
  0x24   :  { %p626_p4 = pnand %p625_p3, %p619_p0 }
  0x25   :  { %590 = vmatpush1.bf16.msra.mxu0 %v589_v39 }
  0x26   :  { %591 = vmatprep.subr.bf16.mxu0 %v642_v6 }
  0x29   :  { %593 = vmatpush1.bf16.msra.mxu0 %v592_v42 }
  0x76   :  { %v47_v43 = vpop.permute.xlu0 %46  ;;  %v69_v44 = vpop.permute.xlu1 %68 }
  0x77   :  { %53 = vst.msk [vmem:[#allocation2] sm:$0x7f] %vm52_vm2, %v47_v43 }
  0x7a   :  { %v58_v45 = vpop.permute.xlu0 %57  ;;  %v49_v46 = vpop.permute.xlu1 %48 }
  0x7b   :  { %64 = vst.msk [vmem:[#allocation2] sm:$0x3f] %vm63_vm3, %v58_v45 }
  0x7c   :  { %54 = vst.msk [vmem:[#allocation2 + $0x10] sm:$0x7f] %vm52_vm2, %v49_v46  ;;  %vm203_vm2 = vmor %vm197_vm14, %vm202_vm15 }
  0x7d   :  { %75 = vst.msk [vmem:[#allocation2] sm:$0x1f] %vm74_vm4, %v69_v44 }
  0x7e   :  { %v60_v47 = vpop.permute.xlu0 %59  ;;  %v71_v48 = vpop.permute.xlu1 %70 }
  0x7f   :  { %65 = vst.msk [vmem:[#allocation2 + $0x10] sm:$0x3f] %vm63_vm3, %v60_v47 }
  0x80   :  { %76 = vst.msk [vmem:[#allocation2 + $0x10] sm:$0x1f] %vm74_vm4, %v71_v48 }
  0x84   :  { %v84_v50 = vld [vmem:[#allocation2] sm:$0xff] }
  0x85   :  { %179 = vmatmul.mubr.f32.vlgmr.msra.gmra.mrb[0].mxu0 %v84_v50 }
  0x86   :  { %523 = vmatprep.mubr.msk.f32.mxu0 %vm36_vm0, %v87_v49  ;;  %vm206_vm0 = vmand %vm204_vm12, %vm205_vm13 }
  0x87   :  { %v86_v51 = vld [vmem:[#allocation2 + $0x10] sm:$0xff]  ;;  %vm208_vm3 = vmand %vm206_vm0, %vm207_vm1 }
  0x88   :  { %vm209_vm4 = vmor %vm203_vm2, %vm208_vm3 }
  0x89   :  { %184 = vmatmul.mubr.f32.gmra.mrb[2].mxu0 %v86_v51 }
 0x158   :  { %v180_v59 = vpop.f32.mrb[0].mxu0 }
 0x159   :  { %v210_v60 = vsel %vm209_vm4, %v180_v59, -inf  ;;  %v182_v61 = vpop.f32.mrb[1].mxu0 }
 0x15a   :  { %v213_v62 = vsel %vm212_vm5, %v210_v60, -inf }
 0x15b   :  { %v214_v63 = vrot.slane %v213_v62, 4 }
 0x15c   :  { %v185_v0 = vpop.f32.mrb[2].mxu0 }
 0x15d   :  { %v215_v1 = vmax.f32 %v213_v62, %v214_v63  ;;  %v211_v2 = vsel %vm209_vm4, %v185_v0, -inf  ;;  %v187_v3 = vpop.f32.mrb[3].mxu0 }
 0x15e   :  { %v220_v4 = vsel %vm212_vm5, %v211_v2, -inf }
 0x15f   :  { %v216_v5 = vrot.slane %v215_v1, 2  ;;  %v221_v7 = vrot.slane %v220_v4, 4 }
 0x161   :  { %v217_v8 = vmax.f32 %v215_v1, %v216_v5  ;;  %v222_v9 = vmax.f32 %v220_v4, %v221_v7 }
 0x163   :  { %v218_v10 = vrot.slane %v217_v8, 1  ;;  %v223_v11 = vrot.slane %v222_v9, 2 }
 0x165   :  { %v224_v12 = vmax.f32 %v222_v9, %v223_v11  ;;  %v219_v13 = vmax.f32 %v217_v8, %v218_v10 }
 0x167   :  { %v225_v15 = vrot.slane %v224_v12, 1  ;;  %v234_v19 = vadd.f32 %v524_v16, %v219_v13 }
 0x169   :  { %v226_v17 = vmax.f32 %v224_v12, %v225_v15  ;;  %v236_v23 = vmax.f32 %v234_v19, 0.0 }
 0x16b   :  { %v235_v18 = vadd.f32 %v524_v16, %v226_v17 }
 0x16d   :  { %v237_v22 = vmax.f32 %v235_v18, 0.0 }
 0x16f   :  { %v250_v24 = vrot.slane %v237_v22, 7 }
 0x171   :  { %v252_v26 = vsel %vm251_vm6, %v250_v24, %v236_v23 }
 0x172   :  { %548 = vmatmul.mubr.msk.f32.vlgmr.msra.gmra.mrb[0].mxu1 %vm212_vm5, %v252_v26  ;;  %vm495_vm5 = vcmask 25600  }
 0x173   :  { %599 = vmatpush3.bf16.msra.mxu1 %v598_v25  ;;  %554 = vmatprep.mubr.msk.f32.mxu1 %vm862_vm7, %v645_v14 }
 0x174   :  { %600 = vmatprep.subr.bf16.mxu1 %v642_v6  ;;  %v414_v6 = vld [vmem:[%s857_s7 + $0x8] sm:$0xff] }
 0x175   :  { %v601_v32 = vpack.c.bf16 %v414_v6, %v413_v31 }
 0x245   :  { %v321_v28 = vpop.f32.mrb[0].mxu1 }
 0x246   :  { %v322_v29 = vadd.f32 %v525_v27, %v321_v28  ;;  %v549_v30 = vpop.f32.mrb[1].mxu1 }
 0x248   :  { %555 = vmatmul.mubr.msk.f32.vlgmr.msra.gmra.mrb[2].mxu1 %vm334_vm8, %v322_v29 }
 0x249   :  { %561 = vmatprep.mubr.msk.f32.mxu1 %vm862_vm7, %v645_v14  ;;  %602 = vmatpush3.bf16.msra.mxu1 %v601_v32 }
 0x31b   :  { %v404_v34 = vpop.f32.mrb[2].mxu1 }
 0x31c   :  { %v405_v35 = vadd.f32 %v527_v33, %v404_v34  ;;  %v556_v36 = vpop.f32.mrb[3].mxu1 }
 0x31e   :  { %v408_v37 = vsub.f32 0.0, %v405_v35 }
 0x320   :  { %v409_v38 = vmul.f32 1.442695, %v408_v37 }
 0x322   :  { %610 = vpow2.f32 %v409_v38 }
 0x32c   :  { %v611_v14 = vpop.eup %610 }
 0x32d   :  { %v411_v39 = vadd.f32 1.0, %v611_v14 }
 0x32f   :  { %612 = vrcp.f32 %v411_v39 }
 0x339   :  { %v613_v40 = vpop.eup %612 }
 0x33a   :  { %562 = vmatmul.mubr.msk.f32.vlgmr.msra.gmra.mrb[4].mxu1 %vm334_vm8, %v613_v40 }
 0x40d   :  { %v491_v42 = vpop.f32.mrb[4].mxu1 }
 0x40e   :  { %v492_v43 = vadd.f32 %v529_v41, %v491_v42  ;;  %v563_v44 = vpop.f32.mrb[5].mxu1 }
 0x410   :  { %v496_v45 = vsel %vm495_vm5, %v492_v43, -inf }
 0x411   :  { %497 = vmax.xlane.f32.xlu0 %v496_v45 }
 0x49e   :  { %v498_v46 = vpop.xlane.xlu0 %497 }
 0x49f   :  { %v499_v47 = vsub.f32 %v492_v43, %v498_v46 }
 0x4a1   :  { %v500_v48 = vmul.f32 1.442695, %v499_v47 }
 0x4a3   :  { %614 = vpow2.f32 %v500_v48 }
 0x4ad   :  { %v615_v49 = vpop.eup %614 }
 0x4ae   :  { %v502_v50 = vsel %vm495_vm5, %v615_v49, 0.0 }
 0x4af   :  { %503 = vadd.xlane.f32.xlu1 %v502_v50 }
 0x53c   :  { %v504_v51 = vpop.xlane.xlu1 %503 }
 0x53d   :  { %616 = vrcp.f32 %v504_v51 }
 0x547   :  { %v617_v52 = vpop.eup %616 }
 0x548   :  { %v506_v53 = vmul.f32 %v617_v52, %v615_v49 }
 0x54a   :  { %507 = vst.msk [vmem:[#allocation3] sm:$0x3] %vm495_vm5, %v506_v53 }
 0x54b   :  { %629 = shalt.err (!%p626_p4)
}
 0x54c   :  { %s630_s30 = scalar_lea.hbm %s859_s9, 32 }
 0x54d   :  { %p631_p5 = scmp.ne.s32.totalorder %s859_s9, %s630_s30  ;;  %p634_p6 = scmp.lt.u32.totalorder %s630_s30, %s859_s9 }
 0x54f   :  { %p636_p7 = pnand %p634_p6, %p631_p5 }
 0x551   :  { %639 = shalt.err (!%p636_p7)
}
 0x552   :  { %517 = dma.vmem_to_hbm [thread:$0]  %s515_s27, 32, %s859_s9, [#allocation4]  }
 0x553   :  { %640 = dma.done.wait [#allocation4], 32  }
 0x554   :  { %641 = vsyncadd [#allocation4], 4294967264 }
 0x555   :  { %521 = vsyncpa [#allocation4], 1 }

</bundles_post_ra>
